<compile_context>
chip_gen: v7x
topology: tpu7x:2x2x1
jax: 0.10.0
libtpu: 0.0.40
codegen_flags: <defaults>
</compile_context>

<pallas_src>
import jax
import jax.numpy as jnp
from jax.experimental import pallas as pl
from jax.experimental.pallas import tpu as pltpu


def _round_up(x, m):
    return ((x + m - 1) // m) * m


def _round_down(x, m):
    return (x // m) * m


def _vmem_capacity_bytes():
    try:
        return int(pltpu.get_tpu_info().vmem_capacity_bytes)
    except Exception:
        return 64 * 1024 * 1024  # conservative fallback (v7x per-core VMEM)


def _downsample_matmul_kernel(pt_ref, w_ref, b_ref, o_ref):
    # pt_ref: (K, tm)   bf16 transposed patch columns (one batch element)
    # w_ref : (tn, K)   bf16 reshaped conv weight (resident across the grid when gco == 1)
    # b_ref : (tn, 1)   f32 bias
    # o_ref : (tn, tm)  output block, written directly in NCDHW layout (lane dim = spatial)
    acc = jnp.dot(w_ref[...], pt_ref[...], preferred_element_type=jnp.float32)
    acc = acc + b_ref[...]
    o_ref[...] = jnp.maximum(acc, 0.0).astype(o_ref.dtype)


def _choose_tiles(K, Cout, M_n, N, budget_bytes, out_itemsize):
    """Pick (tn, tm) from a VMEM byte budget; shrink the Cout tile before the M tile."""
    usable_budget = int(budget_bytes * 0.85)  # ~15% headroom for Mosaic internal scratch
    tn_candidates = [Cout] + [c for c in (512, 256, 128) if c < Cout]
    tn = tn_candidates[-1]
    fixed = per_col = 1
    for cand in tn_candidates:
        fixed = 2 * cand * K * 2 + 2 * cand * 4           # weight + bias (double-buffered)
        per_col = (2 * K * 2                              # patch columns (double-buffered bf16)
                   + 2 * cand * out_itemsize              # output columns (double-buffered)
                   + 2 * cand * 4)                        # f32 matmul acc / bias / ReLU temps
        if usable_budget - fixed >= 128 * per_col:
            tn = cand
            break
    max_cols = max(128, (usable_budget - fixed) // per_col)
    max_cols = min(max_cols, 8192)

    if M_n <= 128:
        tm = M_n                                          # full dim -> always a legal block
    else:
        tm = max(128, _round_down(min(max_cols, M_n), 128))
        if N == 1 and M_n >= 256:
            # make sure the grid has >= 2 M-steps so both v7x TensorCores get work
            tm = min(tm, max(128, _round_up(pl.cdiv(M_n, 2), 128)))
    vmem_needed = fixed + tm * per_col
    return tn, tm, vmem_needed


def downsampling_conv_block(x, weight, bias, stride=2, *, vmem_budget_bytes=None):
    """x: (N, Cin, D, H, W); weight: (Cout, Cin, s, s, s); bias: (Cout,).

    Returns NCDHW (N, Cout, D//s, H//s, W//s), matching the PyTorch module
    (Conv3d(kernel=s, stride=s, padding=0) followed by ReLU, normalization='none').
    """
    N, Cin, D, H, W = x.shape
    Cout = weight.shape[0]
    s = stride
    assert D % s == 0 and H % s == 0 and W % s == 0
    Do, Ho, Wo = D // s, H // s, W // s
    M_n = Do * Ho * Wo
    K = Cin * s * s * s

    # --- glue: transposed patch extraction fused with the bf16 downcast (one XLA pass).
    # TODO(synk): fuse this relayout into the kernel to remove the extra HBM pass over x.
    x8 = x.reshape(N, Cin, Do, s, Ho, s, Wo, s)
    pt = jnp.transpose(x8, (0, 1, 3, 5, 7, 2, 4, 6)).astype(jnp.bfloat16)
    pt = pt.reshape(N, K, M_n)                     # columns ordered (do, ho, wo)

    w2 = weight.reshape(Cout, K).astype(jnp.bfloat16)   # K ordered (cin, sd, sh, sw)
    b2 = bias.astype(jnp.float32).reshape(Cout, 1)

    # --- generation-aware VMEM budgeting (v5e/v6e: 128 MiB, v7x: 64 MiB per core).
    out_itemsize = jnp.dtype(x.dtype).itemsize
    vmem_cap = _vmem_capacity_bytes()
    budget = int(vmem_budget_bytes) if vmem_budget_bytes else int(vmem_cap * 0.40)
    tn, tm, vmem_needed = _choose_tiles(K, Cout, M_n, N, budget, out_itemsize)
    vmem_limit = int(min(vmem_cap * 0.90,
                         max(budget + (8 << 20), vmem_needed + (4 << 20))))

    gm = pl.cdiv(M_n, tm)     # ragged tail handled by Pallas masked stores
    gco = pl.cdiv(Cout, tn)   # 1 in practice: full weight stays resident across the grid

    out = pl.pallas_call(
        _downsample_matmul_kernel,
        out_shape=jax.ShapeDtypeStruct((N, Cout, M_n), x.dtype),
        grid_spec=pltpu.PrefetchScalarGridSpec(
            num_scalar_prefetch=0,
            # j (Cout tiles) innermost so the big (K, tm) patch block is never re-fetched;
            # with gco == 1 the weight/bias block indices are constant -> DMA'd exactly once.
            grid=(N, gm, gco),
            in_specs=[
                pl.BlockSpec((None, K, tm), lambda n, m, j: (n, 0, m)),
                pl.BlockSpec((tn, K), lambda n, m, j: (j, 0)),
                pl.BlockSpec((tn, 1), lambda n, m, j: (j, 0)),
            ],
            out_specs=pl.BlockSpec((None, tn, tm), lambda n, m, j: (n, j, m)),
        ),
        compiler_params=pltpu.CompilerParams(
            dimension_semantics=("parallel", "parallel", "parallel"),
            vmem_limit_bytes=vmem_limit,
        ),
    )(pt, w2, b2)

    # (N, Cout, M_n) IS the NCDHW layout: this reshape is free (no transpose, no slice).
    return out.reshape(N, Cout, Do, Ho, Wo)


def reference_downsampling_conv_block(x, weight, bias, stride=2):
    """Pure-JAX reference (Conv3d k=s, stride=s, pad=0, then ReLU)."""
    y = jax.lax.conv_general_dilated(
        x, weight,
        window_strides=(stride, stride, stride),
        padding="VALID",
        dimension_numbers=("NCDHW", "OIDHW", "NCDHW"),
    )
    y = y + bias.reshape(1, -1, 1, 1, 1)
    return jnp.maximum(y, 0.0)


if __name__ == "__main__":
    key = jax.random.PRNGKey(0)
    k_x, k_w, k_b = jax.random.split(key, 3)

    # small shapes consistent with the module
    N, Cin, Cout, D, H, W, stride = 2, 4, 8, 8, 8, 8, 2

    x = jax.random.normal(k_x, (N, Cin, D, H, W), dtype=jnp.float32)
    fan_in = Cin * stride ** 3
    bound = 1.0 / (fan_in ** 0.5)
    weight = jax.random.uniform(
        k_w, (Cout, Cin, stride, stride, stride),
        minval=-bound, maxval=bound, dtype=jnp.float32)
    bias = jax.random.uniform(
        k_b, (Cout,), minval=-bound, maxval=bound, dtype=jnp.float32)

    out = downsampling_conv_block(x, weight, bias, stride=stride)
    out = jax.block_until_ready(out)
    assert out.shape == (N, Cout, D // stride, H // stride, W // stride)

    # Matched-precision reference: identical bf16 rounding of the matmul operands,
    # f32 accumulation -> differences are only accumulation-order noise.
    xr = x.astype(jnp.bfloat16).astype(jnp.float32)
    wr = weight.astype(jnp.bfloat16).astype(jnp.float32)
    ref_matched = reference_downsampling_conv_block(xr, wr, bias, stride=stride)
    assert jnp.allclose(out, ref_matched, atol=2e-3, rtol=2e-3), \
        "mismatch vs matched-precision reference"

    # Sanity check against the full-precision reference at bf16-level tolerance.
    ref_full = reference_downsampling_conv_block(x, weight, bias, stride=stride)
    assert jnp.allclose(out, ref_full, atol=5e-2, rtol=5e-2), \
        "mismatch vs f32 reference"

    print("KERNEL_OK")
</pallas_src>

<mosaic_0001>
module attributes {stable_mosaic.version = 11 : i64} {
  func.func @_downsample_matmul_kernel(%arg0: i32, %arg1: i32, %arg2: i32, %arg3: memref<1x32x64xbf16, #tpu.memory_space<vmem>>, %arg4: memref<8x32xbf16, #tpu.memory_space<vmem>>, %arg5: memref<8x1xf32, #tpu.memory_space<vmem>>, %arg6: memref<1x8x64xf32, #tpu.memory_space<vmem>>) attributes {dimension_semantics = [#tpu.dimension_semantics<parallel>, #tpu.dimension_semantics<parallel>, #tpu.dimension_semantics<parallel>], iteration_bounds = array<i64: 2, 1, 1>, scalar_prefetch = 0 : i64, scratch_operands = 0 : i64, tpu.core_type = #tpu.core_type<tc>, window_params = [{transform_indices = @transform_0, window_bounds = array<i64: 1, 32, 64>}, {transform_indices = @transform_1, window_bounds = array<i64: 8, 32>}, {transform_indices = @transform_2, window_bounds = array<i64: 8, 1>}, {transform_indices = @transform_3, window_bounds = array<i64: 1, 8, 64>}]} {
    %c0 = arith.constant 0 : index
    %c0_0 = arith.constant 0 : index
    %0 = vector.load %arg4[%c0, %c0_0] : memref<8x32xbf16, #tpu.memory_space<vmem>>, vector<8x32xbf16>
    %c0_1 = arith.constant 0 : index
    %c0_2 = arith.constant 0 : index
    %c0_3 = arith.constant 0 : index
    %1 = vector.load %arg3[%c0_1, %c0_2, %c0_3] : memref<1x32x64xbf16, #tpu.memory_space<vmem>>, vector<1x32x64xbf16>
    %2 = vector.shape_cast %1 : vector<1x32x64xbf16> to vector<32x64xbf16>
    %cst = arith.constant dense<0.000000e+00> : vector<8x64xf32>
    %3 = tpu.matmul %0, %2, %cst {dimension_numbers = #tpu.dot_dimension_numbers<[1], [0], [0], [1], [0, 0, 1, 1], [], []>} : vector<8x32xbf16>, vector<32x64xbf16>, vector<8x64xf32> -> vector<8x64xf32>
    %c0_4 = arith.constant 0 : index
    %c0_5 = arith.constant 0 : index
    %4 = vector.load %arg5[%c0_4, %c0_5] : memref<8x1xf32, #tpu.memory_space<vmem>>, vector<8x1xf32>
    %5 = vector.broadcast %4 : vector<8x1xf32> to vector<8x64xf32>
    %6 = arith.addf %3, %5 : vector<8x64xf32>
    %cst_6 = arith.constant 0.000000e+00 : f32
    %7 = vector.broadcast %cst_6 : f32 to vector<8x64xf32>
    %8 = arith.maximumf %6, %7 : vector<8x64xf32>
    %c0_7 = arith.constant 0 : index
    %c0_8 = arith.constant 0 : index
    %c0_9 = arith.constant 0 : index
    %9 = vector.load %arg6[%c0_7, %c0_8, %c0_9] : memref<1x8x64xf32, #tpu.memory_space<vmem>>, vector<1x8x64xf32>
    %10 = vector.shape_cast %9 : vector<1x8x64xf32> to vector<8x64xf32>
    %11 = vector.shape_cast %8 : vector<8x64xf32> to vector<1x8x64xf32>
    tpu.vector_store %arg6[%c0_7, %c0_8, %c0_9], %11 {strides = array<i32>} : memref<1x8x64xf32, #tpu.memory_space<vmem>>, vector<1x8x64xf32>,
    return
  }
  func.func @transform_0(%arg0: i32, %arg1: i32, %arg2: i32) -> (i32, i32, i32) {
    %c0_i32 = arith.constant 0 : i32
    %c0_i32_0 = arith.constant 0 : i32
    return %arg0, %c0_i32, %arg1 : i32, i32, i32
  }
  func.func @transform_1(%arg0: i32, %arg1: i32, %arg2: i32) -> (i32, i32) {
    %c0_i32 = arith.constant 0 : i32
    %c0_i32_0 = arith.constant 0 : i32
    return %arg2, %c0_i32 : i32, i32
  }
  func.func @transform_2(%arg0: i32, %arg1: i32, %arg2: i32) -> (i32, i32) {
    %c0_i32 = arith.constant 0 : i32
    %c0_i32_0 = arith.constant 0 : i32
    return %arg2, %c0_i32 : i32, i32
  }
  func.func @transform_3(%arg0: i32, %arg1: i32, %arg2: i32) -> (i32, i32, i32) {
    %c0_i32 = arith.constant 0 : i32
    return %arg0, %arg2, %arg1 : i32, i32, i32
  }
}

</mosaic_0001>

<bundles_post_ra>
// kernel: tpu_custom_call.1
= control target key start
LH: loop header
LB: loop body
LE: loop exit
PB: predicated region body
PF: predicated region fallthrough
CT: control target
= control target key end

     0   :  { %8 = vsyncpa [#allocation3], 0  ;;  %s873_s0 = inlined_call_operand.hbm [shape: bf16[2,32,64], index: 0, kind: input, shape index: {}]   ;;  %s874_s1 = inlined_call_operand.vmem [shape: bf16[8,32], index: 1, kind: input, shape index: {}]   ;;  %s875_s2 = inlined_call_operand.vmem [shape: f32[8,1], index: 2, kind: input, shape index: {}]   ;;  %s876_s3 = inlined_call_operand.hbm [shape: f32[2,8,64], index: 3, kind: output, shape index: {}]  }
   0x1   :  { %10 = vsyncpa [#allocation3 + $0x1], 0 }
   0x2   :  { %11 = vsyncpa [#allocation4], 0 }
   0x3   :  { %13 = vsyncpa [#allocation4 + $0x1], 0  ;;  %s693_s12 = smov 0   ;;  %s695_s13 = smov 0  }
   0x4   :  { %s697_s14 = smov 0   ;;  %s699_s15 = smov 0  }
   0x5   :  { %s701_s16 = smov 0   ;;  %s703_s17 = smov 0  }
   0x6 LB: > { %s451_s18 = sadd.s32 4294967295, %s664_s17   ;;  %s452_s19 = sadd.s32 4294967294, %s664_s17   ;;  %s664_s17 = sphi %s703_s17, %s19_s17   ;;  %s660_s16 = sphi %s701_s16, %s891_s16   ;;  %s656_s15 = sphi %s699_s15, %s890_s15   ;;  %s652_s14 = sphi %s697_s14, %s889_s14   ;;  %s648_s13 = sphi %s695_s13, %s888_s13   ;;  %s644_s12 = sphi %s693_s12, %s887_s12  }
   0x7   : > { %s38_s20 = sadd.s32 1, %s660_s16  ;;  %s47_s21 = sadd.s32 1, %s652_s14 }
   0x8   : > { %p40_p0 = scmp.ge.s32.totalorder %s38_s20, 2  ;;  %p54_p1 = scmp.ne.s32.totalorder %s652_s14, %s648_s13 }
   0x9   : > { %p55_p2 = scmp.eq.s32.totalorder %s664_s17, 0  ;;  %p60_p3 = scmp.ne.s32.totalorder %s648_s13, %s644_s12 }
   0xa   : > { %s893_s20 = smov (%p40_p0, %s38_s20), 0  ;;  %p61_p5 = scmp.eq.s32.totalorder %s451_s18, 0 }
   0xb   : > { %p734_p4 = por %p55_p2, %p54_p1  ;;  %s42_s23 = ssub.s32 %s660_s16, %s893_s20 }
   0xc   : > { %p140_p6 = scmp.eq.s32.totalorder %s451_s18, 1  ;;  %p45_p7 = scmp.eq.s32.totalorder %s42_s23, 0 }
   0xd   : > { %p740_p8 = por %p61_p5, %p60_p3  ;;  %p146_p10 = scmp.eq.s32.totalorder %s452_s19, 1 }
   0xe   : > { %p744_p9 = por %p140_p6, %p54_p1  ;;  %p494_p13 = scmp.lt.s32.totalorder %s664_s17, 2 }
   0xf   : > { %s749_s26 = scalar_select %p45_p7, %s652_s14, %s47_s21  }
  0x10   : > { %s880_s25 = scalar_select %p744_p9, 1, 0 }
  0x11   : > { %p751_p11 = por %p146_p10, %p60_p3  ;;  %s180_s28 = sand.u32 1, %s652_s14  }
  0x12   : > { %s457_s29 = sshll.u32 %s180_s28, 4  ;;  %s470_s30 = sshll.u32 %s660_s16, 8 }
  0x13   : > { %s881_s27 = scalar_select %p751_p11, 1, 0 }
  0x14   : > { %s762_s6 = scalar_lea.hbm %s873_s0, %s470_s30  ;;  %s184_s7 = scalar_lea.vmem [#allocation2], %s457_s29 }
  0x15   : > { %s192_s8 = sshll.u32 %s184_s7, 4  ;;  %p768_p0 = pnand %p494_p13, %p734_p4  ;;  %s764_s8 = int_to_ptr.vmem [resolvable:$true] %s192_s8 }
  0x16   : > { %s773_s10 = scalar_lea.sflag [#allocation3], %s180_s28  ;;  %s552_s11 = scalar_lea.hbm %s762_s6, 256 }
  0x17   : > { %p553_p2 = scmp.ne.s32.totalorder %s762_s6, %s552_s11  ;;  %p554_p3 = pneg %p768_p0 }
  0x18   : > { %s557_s21 = scalar_lea.hbm %s873_s0, 512  ;;  %p558_p4 = scmp.lt.u32.totalorder %s762_s6, %s873_s0 }
  0x19   : > { %p555_p5 = pnand %p554_p3, %p553_p2  ;;  %p559_p7 = scmp.lt.u32.totalorder %s557_s21, %s552_s11 }
  0x1a   : > { %p561_p13 = scmp.lt.u32.totalorder %s552_s11, %s762_s6 }
  0x1b   : > { %p556_p6 = pneg %p555_p5  ;;  %p560_p10 = por %p559_p7, %p558_p4 }
  0x1d   : > { %p562_p12 = por %p561_p13, %p560_p10 }
  0x1f   : > { %p563_p1 = pnand %p562_p12, %p556_p6 }
  0x21   : > { %566 = shalt.err (!%p563_p1)
}
  0x22   : > { %s567_s28 = scalar_lea.vmem %s764_s8, 256  ;;  %s666_s29 = smov [#allocation2]  }
  0x23   : > { %p568_p2 = scmp.ne.s32.totalorder %s764_s8, %s567_s28  ;;  %s572_s30 = sshll.u32 %s666_s29, 4  ;;  %s573_s30 = int_to_ptr.vmem [resolvable:$false] %s572_s30 }
  0x24   : > { %s574_s4 = scalar_lea.vmem %s573_s30, 512  ;;  %p575_p9 = scmp.lt.s32.totalorder %s764_s8, %s573_s30 }
  0x25   : > { %p570_p5 = pnand %p568_p2, %p554_p3  ;;  %p576_p4 = scmp.lt.s32.totalorder %s574_s4, %s567_s28 }
  0x27   : > { %p571_p11 = pneg %p570_p5  ;;  %p577_p7 = por %p576_p4, %p575_p9 }
  0x29   : > { %p578_p10 = pnand %p577_p7, %p571_p11 }
  0x2b   : > { %581 = shalt.err (!%p578_p10)
}
  0x2c   : > { %s667_s5 = smov 64   ;;  %s668_s7 = smov 4  }
  0x2d   : > { %489 = dma.hbm_to_vmem [thread:$0]  (!%p768_p0), %s762_s6, 256, %s764_s8, %s773_s10, %s667_s5, %s667_s5, %s668_s7  }
  0x2e   : > { %p200_p12 = scmp.lt.s32.totalorder %s664_s17, 3  ;;  %p883_p1 = scmp.ge.s32.totalorder %s664_s17, 1 }
  0x30   : > { %p201_p3 = pnand %p883_p1, %p200_p12 }
  0x31   : > { %s805_s11 = sand.u32 (!%p201_p3), 1, %s648_s13  }
  0x32   : > { %204 = sbr.rel (%p201_p3) target bundleno = 297 (0x129), region = 32  ;;  %s461_s18 = sshll.u32 (!%p201_p3), %s805_s11, 4 }
  0x33   : > { %s207_s19 = scalar_lea.sflag (!%p201_p3), [#allocation3], %s805_s11  ;;  %s210_s21 = scalar_lea.vmem (!%p201_p3), [#allocation2], %s461_s18 }
  0x39   : > { %635 = dma.done.wait (%p740_p8), %s207_s19, 256  }
  0x3a   : > { %637 = vsyncadd (%p740_p8), %s207_s19, 4294967040  ;;  %v669_v0 = vmov 0.0   ;;  %vm670_vm0 = vmmov 0   ;;  %v671_v1 = vmov 0   ;;  %v550_v2 = vld [vmem:[%s210_s21] sm:$0xff]   ;;  %v551_v3 = vld [vmem:[%s210_s21 + $0x8] sm:$0xff]  }
  0x3b   : > { %474 = vmatprep.subr.bf16.mxu0 %v669_v0  ;;  %478 = vmatprep.mubr.msk.bf16.mxu0 %vm670_vm0, %v669_v0  ;;  %v255_v4 = vld [vmem:[%s875_s2] sm:$0xff]  ;;  %vm273_vm1 = vcmask 261120   ;;  %s462_s10 = sshll.u32 %s805_s11, 3  ;;  %s467_s22 = sshll.u32 %s656_s15, 7  ;;  %vm318_vm2 = vcmask 523264  }
  0x3c   : > { %549 = vset.pattern.permute.xlu0 %v671_v1  ;;  %475 = vmatpush3.bf16.msra.mxu0 %v550_v2  ;;  %v250_v5 = vld [vmem:[%s874_s1] sm:$0xf]  ;;  %s240_s23 = scalar_lea.vmem [#allocation5], %s462_s10  ;;  %s824_s4 = scalar_lea.hbm %s876_s3, %s467_s22 }
  0x3d   : > { %476 = vmatprep.subr.bf16.mxu0 %v669_v0  ;;  %258 = vperm.xlu0 %549, %v255_v4   ;;  %s336_s28 = sshll.u32 %s240_s23, 4  ;;  %s321_s15 = scalar_lea.sflag [#allocation4], %s805_s11  ;;  %s826_s28 = int_to_ptr.vmem [resolvable:$true] %s336_s28 }
  0x3e   : > { %s582_s5 = scalar_lea.vmem %s826_s28, 128  ;;  %p884_p9 = scmp.ne.s32.totalorder %s880_s25, 0 }
  0x3f   : > { %p583_p8 = scmp.ne.s32.totalorder %s826_s28, %s582_s5  ;;  %s672_s7 = smov [#allocation5]  }
  0x40   : > { %477 = vmatpush3.bf16.msra.mxu0 %v551_v3  ;;  %s586_s18 = sshll.u32 %s672_s7, 4  ;;  %s587_s18 = int_to_ptr.vmem [resolvable:$false] %s586_s18 }
  0x41   : > { %p584_p11 = pnand %p583_p8, %p884_p9  ;;  %s588_s19 = scalar_lea.vmem %s587_s18, 256 }
  0x42   : > { %p589_p6 = scmp.lt.s32.totalorder %s826_s28, %s587_s18  ;;  %p590_p13 = scmp.lt.s32.totalorder %s588_s19, %s582_s5 }
  0x43   : > { %479 = vmatmul.mubr.msk.bf16.vlgmr.msra.gmra.mrb[0].mxu0 %vm273_vm1, %v250_v5  ;;  %p585_p0 = pneg %p584_p11 }
  0x44   : > { %p591_p2 = por %p590_p13, %p589_p6 }
  0x46   : > { %p592_p5 = pnand %p591_p2, %p585_p0 }
  0xbc   : > { %v259_v6 = vpop.permute.xlu0 %258 }
 0x116   : > { %v311_v7 = vpop.f32.mrb[0].mxu0 }
 0x117   : > { %v312_v8 = vadd.f32 %v311_v7, %v259_v6  ;;  %v480_v9 = vpop.f32.mrb[1].mxu0 }
 0x118   : > { %v314_v10 = vpop.f32.mrb[2].mxu0 }
 0x119   : > { %v317_v11 = vmax.f32 %v312_v8, 0.0  ;;  %v481_v12 = vpop.f32.mrb[3].mxu0 }
 0x11b   : > { %319 = vst.msk [vmem:[%s240_s23] sm:$0xff] %vm318_vm2, %v317_v11 }
 0x11c   : > { %595 = shalt.err (!%p592_p5)
}
 0x11d   : > { %s596_s11 = scalar_lea.hbm %s824_s4, 128  ;;  %s600_s8 = scalar_lea.hbm %s876_s3, 256 }
 0x11e   : > { %p597_p4 = scmp.ne.s32.totalorder %s824_s4, %s596_s11  ;;  %p601_p12 = scmp.lt.u32.totalorder %s824_s4, %s876_s3 }
 0x11f   : > { %p602_p1 = scmp.lt.u32.totalorder %s600_s8, %s596_s11  ;;  %p604_p8 = scmp.lt.u32.totalorder %s596_s11, %s824_s4 }
 0x120   : > { %p598_p7 = pnand %p597_p4, %p884_p9 }
 0x121   : > { %p603_p3 = por %p602_p1, %p601_p12 }
 0x122   : > { %p599_p10 = pneg %p598_p7 }
 0x123   : > { %p605_p11 = por %p604_p8, %p603_p3 }
 0x125   : > { %p606_p0 = pnand %p605_p11, %p599_p10 }
 0x127   : > { %609 = shalt.err (!%p606_p0)
}
 0x128   : > { %484 = dma.vmem_to_hbm [thread:$0]  (%p884_p9), %s826_s28, 128, %s824_s4, %s321_s15  }
 0x129 PF: > { %s348_s10 = sand.u32 1, %s644_s12   ;;  %p885_p6 = scmp.ne.s32.totalorder %s881_s27, 0 }
 0x12a   : > { %p886_p13 = scmp.ge.s32.totalorder %s664_s17, 2  ;;  %s349_s22 = scalar_lea.sflag [#allocation4], %s348_s10 }
 0x12c   : > { %p491_p2 = pnand %p886_p13, %p885_p6 }
 0x12e   : > { %639 = dma.done.wait (!%p491_p2), %s349_s22, 128  }
 0x12f   : > { %641 = vsyncadd (!%p491_p2), %s349_s22, 4294967168  ;;  %s19_s17 = sadd.s32 1, %s664_s17   ;;  %s887_s12 = smov %s648_s13 }
 0x130   : > { %p16_p5 = scmp.ge.s32.totalorder %s19_s17, 4   ;;  %s888_s13 = smov %s652_s14 }
 0x131   : > { %s889_s14 = smov %s749_s26  ;;  %s890_s15 = smov %s660_s16 }
 0x132   : > { %s891_s16 = smov %s893_s20  ;;  %18 = sbr.rel (!%p16_p5) target bundleno = 6 (0x6), region = 83 }
 0x139   :  { %354 = vsyncpa [#allocation3], 1 }
 0x13a   :  { %356 = vsyncpa [#allocation3 + $0x1], 1 }
 0x13b   :  { %357 = vsyncpa [#allocation4], 1 }
 0x13c   :  { %359 = vsyncpa [#allocation4 + $0x1], 1 }

</bundles_post_ra>
